<compile_context>
chip_gen: v7x
topology: tpu7x:2x2x1
jax: 0.10.0
libtpu: 0.0.40
codegen_flags: <defaults>
</compile_context>

<pallas_src>
import jax
import jax.numpy as jnp
from jax import lax
from jax.experimental import pallas as pl
from jax.experimental.pallas import tpu as pltpu

MOLECULE_DIM = 768
FUSE_DIM = 128          # output_dim of the (synthetic) fuse model
BN_EPS = 1e-5
OUT_PAD = 128           # lane-dense padded width of the final output slab


def _round_up(x, m):
    return (x + m - 1) // m * m


def _vmem_specs(n):
    return [pl.BlockSpec(memory_space=pltpu.MemorySpace.VMEM) for _ in range(n)]


# ---------------- Kernel 1: masked mean pooling (MolToVec.to_vec tail) -------
def _pool_kernel(h_ref, m_ref, o_ref, cnt_ref):
    j = pl.program_id(1)

    @pl.when(j == 0)
    def _():
        o_ref[...] = jnp.zeros_like(o_ref)
        cnt_ref[...] = jnp.zeros_like(cnt_ref)

    h = h_ref[...]                          # [bt, st, H]
    m = m_ref[...]                          # [bt, st, 1]
    o_ref[...] += jnp.sum(h * m, axis=1)    # accumulate masked sum  [bt, H]
    cnt_ref[...] += jnp.sum(m, axis=1)      # accumulate token count [bt, 1]

    @pl.when(j == pl.num_programs(1) - 1)
    def _():
        # guard all-zero masks; exact divide (tiny [bt,1] op, keeps parity
        # with the torch reference's sum/count division)
        o_ref[...] = o_ref[...] / jnp.maximum(cnt_ref[...], 1.0)


def masked_mean_pool(hidden_states, mask3, batch_tile, seq_tile):
    Bp, Sp, H = hidden_states.shape
    grid = (Bp // batch_tile, Sp // seq_tile)
    return pl.pallas_call(
        _pool_kernel,
        out_shape=jax.ShapeDtypeStruct((Bp, H), jnp.float32),
        grid_spec=pltpu.PrefetchScalarGridSpec(
            num_scalar_prefetch=0,
            grid=grid,
            in_specs=[
                pl.BlockSpec((batch_tile, seq_tile, H), lambda i, j: (i, j, 0)),
                pl.BlockSpec((batch_tile, seq_tile, 1), lambda i, j: (i, j, 0)),
            ],
            out_specs=pl.BlockSpec((batch_tile, H), lambda i, j: (i, 0)),
            scratch_shapes=[pltpu.VMEM((batch_tile, 1), jnp.float32)],
        ),
        compiler_params=pltpu.CompilerParams(
            dimension_semantics=("parallel", "arbitrary"),
            vmem_limit_bytes=64 * 1024 * 1024,
        ),
    )(hidden_states, mask3)


# -------- Kernel 2: fused (fuse-linear + concat + 6-layer MLP w/ BN) ---------
# TODO(synk): MiltyModalLinear's real config/weights come from a checkpoint;
# modeled here as a single deterministic Linear 768 -> FUSE_DIM.
def make_fused_mlp_kernel(use_fuse, n_valid):
    inv_n = 1.0 / float(n_valid)

    def bn(y, vm, g, beta, relu):
        # training-mode BatchNorm1d: biased batch stats over VALID rows only
        if relu:
            y = jnp.maximum(y, 0.0)
        ym = y * vm
        mean = jnp.sum(ym, axis=0, keepdims=True) * inv_n
        ex2 = jnp.sum(ym * ym, axis=0, keepdims=True) * inv_n
        var = ex2 - mean * mean
        return g * (y - mean) * lax.rsqrt(var + BN_EPS) + beta

    def kernel(*refs):
        o_ref = refs[-1]
        it = iter(refs[:-1])
        x_ref = next(it)
        vm_ref = next(it)
        x = x_ref[...]                       # [Bp, 768] f32 pooled molecule
        vm = vm_ref[...]                     # [Bp, 1]   valid-row mask
        xb = x.astype(jnp.bfloat16)

        if use_fuse:
            fw, fb = next(it), next(it)
            w1t, w1b, b1, g1, be1 = (next(it), next(it), next(it),
                                     next(it), next(it))
            # fuse projection (stays in VMEM / vregs, never hits HBM)
            mf = jnp.dot(xb, fw[...], preferred_element_type=jnp.float32) + fb[...]
            # concat([x, mf]) @ W1 == x @ W1_top + mf @ W1_bot
            y = (jnp.dot(xb, w1t[...], preferred_element_type=jnp.float32)
                 + jnp.dot(mf.astype(jnp.bfloat16), w1b[...],
                           preferred_element_type=jnp.float32)
                 + b1[...])
        else:
            w1t, b1, g1, be1 = next(it), next(it), next(it), next(it)
            y = jnp.dot(xb, w1t[...], preferred_element_type=jnp.float32) + b1[...]
        y = bn(y, vm, g1[...], be1[...], relu=True)

        # hidden layers: 1024->512->256->128->64, each Linear -> ReLU -> BN
        for _ in range(4):
            w, b, g, be = next(it), next(it), next(it), next(it)
            y = jnp.dot(y.astype(jnp.bfloat16), w[...],
                        preferred_element_type=jnp.float32) + b[...]
            y = bn(y, vm, g[...], be[...], relu=True)

        # final 64 -> 1 Linear (no ReLU) as VPU multiply + lane reduce, then BN
        w6t, b6, g6, be6 = next(it), next(it), next(it), next(it)
        y = jnp.sum(y * w6t[...], axis=1, keepdims=True) + b6[...]   # [Bp, 1]
        y = bn(y, vm, g6[...], be6[...], relu=False)

        # lane-dense store: broadcast across 128 lanes; wrapper slices col 0.
        o_ref[...] = jnp.broadcast_to(y, o_ref.shape)

    return kernel


# ---------------- Parameter init (torch.nn.Linear-style, deterministic) ------
def init_params(key, use_fuse=True):
    params = {}
    if use_fuse:
        kf, kfb, key = jax.random.split(key, 3)
        lim = 1.0 / float(MOLECULE_DIM) ** 0.5
        params["fuse_w"] = jax.random.uniform(
            kf, (MOLECULE_DIM, FUSE_DIM), jnp.float32, -lim, lim)
        params["fuse_b"] = jax.random.uniform(
            kfb, (1, FUSE_DIM), jnp.float32, -lim, lim)

    in_dim = MOLECULE_DIM + (FUSE_DIM if use_fuse else 0)
    dims = [in_dim, 1024, 512, 256, 128, 64, 1]
    layers = []
    for i in range(len(dims) - 1):
        din, dout = dims[i], dims[i + 1]
        kw, kb, key = jax.random.split(key, 3)
        lim = 1.0 / float(din) ** 0.5
        w = jax.random.uniform(kw, (din, dout), jnp.float32, -lim, lim)
        b = jax.random.uniform(kb, (1, dout), jnp.float32, -lim, lim)
        gamma = jnp.ones((1, dout), jnp.float32)
        beta = jnp.zeros((1, dout), jnp.float32)
        layers.append((w, b, gamma, beta))
    params["layers"] = layers
    params["dims"] = dims
    return params


# ---------------- Forward -----------------------------------------------------
def molecule_prot_forward(params, hidden_states, attention_mask, use_fuse=True):
    # TODO(synk): the pretrained ChemBERTa encoder (AutoModelForMaskedLM) that
    # produces `hidden_states` has no Pallas equivalent; kernels start from it.
    B, S, H = hidden_states.shape

    # pad batch to a sublane multiple and seq to the seq-tile multiple
    Bp = _round_up(B, 8)
    bt = 8
    st = min(128, _round_up(S, 8))
    Sp = _round_up(S, st)

    hs = jnp.zeros((Bp, Sp, H), jnp.float32)
    hs = hs.at[:B, :S, :].set(hidden_states.astype(jnp.float32))
    m3 = jnp.zeros((Bp, Sp, 1), jnp.float32)
    m3 = m3.at[:B, :S, 0].set(attention_mask.astype(jnp.float32))

    # 1) masked mean pooling (tiled, pipelined)
    pooled = masked_mean_pool(hs, m3, bt, st)                 # [Bp, 768]

    # 2) fused fuse-linear + MLP kernel (weights bf16, accumulation f32)
    vm = (jnp.arange(Bp) < B).astype(jnp.float32).reshape(Bp, 1)

    def bf16(w):
        return w.astype(jnp.bfloat16)

    layers = params["layers"]
    args = [pooled, vm]
    w1, b1, g1, be1 = layers[0]
    if use_fuse:
        args += [bf16(params["fuse_w"]), params["fuse_b"],
                 bf16(w1[:MOLECULE_DIM]), bf16(w1[MOLECULE_DIM:]), b1, g1, be1]
    else:
        args += [bf16(w1), b1, g1, be1]
    for (w, b, g, be) in layers[1:5]:
        args += [bf16(w), b, g, be]
    w6, b6, g6, be6 = layers[5]
    args += [jnp.transpose(w6), b6, g6, be6]   # [1, 64] f32 for the VPU tail

    dims = params["dims"]
    flops = 2 * B * sum(a * c for a, c in zip(dims[:-1], dims[1:]))
    if use_fuse:
        flops += 2 * B * MOLECULE_DIM * FUSE_DIM
    bytes_accessed = int(sum(int(a.size) * a.dtype.itemsize for a in args)
                         + Bp * OUT_PAD * 4)
    cost = pl.CostEstimate(flops=int(flops), transcendentals=2048,
                           bytes_accessed=bytes_accessed)

    out = pl.pallas_call(
        make_fused_mlp_kernel(use_fuse, n_valid=B),
        out_shape=jax.ShapeDtypeStruct((Bp, OUT_PAD), jnp.float32),
        in_specs=_vmem_specs(len(args)),
        out_specs=pl.BlockSpec(memory_space=pltpu.MemorySpace.VMEM),
        compiler_params=pltpu.CompilerParams(vmem_limit_bytes=64 * 1024 * 1024),
        cost_estimate=cost,
    )(*args)

    return out[:B, 0:1]                                        # [B, 1]


if __name__ == "__main__":
    key = jax.random.PRNGKey(0)
    kp, kh = jax.random.split(key)
    USE_FUSE = True
    params = init_params(kp, use_fuse=USE_FUSE)

    B, S = 2, 8
    hidden_states = jax.random.normal(kh, (B, S, MOLECULE_DIM), jnp.float32)
    lens = jnp.array([S, S - 3])
    attention_mask = (jnp.arange(S)[None, :] < lens[:, None]).astype(jnp.float32)

    out = molecule_prot_forward(params, hidden_states, attention_mask,
                                use_fuse=USE_FUSE)
    jax.block_until_ready(out)
    assert out.shape == (B, 1) and out.dtype == jnp.float32
    print("KERNEL_OK")
</pallas_src>

<mosaic_0001>
module attributes {stable_mosaic.version = 11 : i64} {
  func.func @_pool_kernel(%arg0: i32, %arg1: i32, %arg2: memref<8x8x768xf32, #tpu.memory_space<vmem>>, %arg3: memref<8x8x1xf32, #tpu.memory_space<vmem>>, %arg4: memref<8x768xf32, #tpu.memory_space<vmem>>, %arg5: memref<8x1xf32, #tpu.memory_space<vmem>>) attributes {dimension_semantics = [#tpu.dimension_semantics<parallel>, #tpu.dimension_semantics<arbitrary>], iteration_bounds = array<i64: 1, 1>, scalar_prefetch = 0 : i64, scratch_operands = 1 : i64, tpu.core_type = #tpu.core_type<tc>, window_params = [{transform_indices = @transform_0, window_bounds = array<i64: 8, 8, 768>}, {transform_indices = @transform_1, window_bounds = array<i64: 8, 8, 1>}, {transform_indices = @transform_2, window_bounds = array<i64: 8, 768>}]} {
    %c0_i32 = arith.constant 0 : i32
    %0 = arith.cmpi eq, %arg1, %c0_i32 : i32
    %1 = arith.extui %0 : i1 to i32
    %c0_i32_0 = arith.constant 0 : i32
    %2 = arith.cmpi ne, %1, %c0_i32_0 : i32
    scf.if %2 {
      %cst_17 = arith.constant 0.000000e+00 : f32
      %18 = vector.broadcast %cst_17 : f32 to vector<8x768xf32>
      %c0_18 = arith.constant 0 : index
      %c0_19 = arith.constant 0 : index
      %19 = vector.load %arg4[%c0_18, %c0_19] : memref<8x768xf32, #tpu.memory_space<vmem>>, vector<8x768xf32>
      tpu.vector_store %arg4[%c0_18, %c0_19], %18 {strides = array<i32>} : memref<8x768xf32, #tpu.memory_space<vmem>>, vector<8x768xf32>,
      %cst_20 = arith.constant 0.000000e+00 : f32
      %20 = vector.broadcast %cst_20 : f32 to vector<8x1xf32>
      %c0_21 = arith.constant 0 : index
      %c0_22 = arith.constant 0 : index
      %21 = vector.load %arg5[%c0_21, %c0_22] : memref<8x1xf32, #tpu.memory_space<vmem>>, vector<8x1xf32>
      tpu.vector_store %arg5[%c0_21, %c0_22], %20 {strides = array<i32>} : memref<8x1xf32, #tpu.memory_space<vmem>>, vector<8x1xf32>,
    } else {
    }
    %c0 = arith.constant 0 : index
    %c0_1 = arith.constant 0 : index
    %c0_2 = arith.constant 0 : index
    %3 = vector.load %arg2[%c0, %c0_1, %c0_2] : memref<8x8x768xf32, #tpu.memory_space<vmem>>, vector<8x8x768xf32>
    %c0_3 = arith.constant 0 : index
    %c0_4 = arith.constant 0 : index
    %c0_5 = arith.constant 0 : index
    %4 = vector.load %arg3[%c0_3, %c0_4, %c0_5] : memref<8x8x1xf32, #tpu.memory_space<vmem>>, vector<8x8x1xf32>
    %c0_6 = arith.constant 0 : index
    %c0_7 = arith.constant 0 : index
    %5 = vector.load %arg4[%c0_6, %c0_7] : memref<8x768xf32, #tpu.memory_space<vmem>>, vector<8x768xf32>
    %6 = vector.broadcast %4 : vector<8x8x1xf32> to vector<8x8x768xf32>
    %7 = arith.mulf %3, %6 : vector<8x8x768xf32>
    %cst = arith.constant dense<0.000000e+00> : vector<8x768xf32>
    %8 = vector.multi_reduction <add>, %7, %cst [1] : vector<8x8x768xf32> to vector<8x768xf32>
    %9 = arith.addf %5, %8 : vector<8x768xf32>
    %c0_8 = arith.constant 0 : index
    %c0_9 = arith.constant 0 : index
    %10 = vector.load %arg4[%c0_8, %c0_9] : memref<8x768xf32, #tpu.memory_space<vmem>>, vector<8x768xf32>
    tpu.vector_store %arg4[%c0_8, %c0_9], %9 {strides = array<i32>} : memref<8x768xf32, #tpu.memory_space<vmem>>, vector<8x768xf32>,
    %c0_10 = arith.constant 0 : index
    %c0_11 = arith.constant 0 : index
    %11 = vector.load %arg5[%c0_10, %c0_11] : memref<8x1xf32, #tpu.memory_space<vmem>>, vector<8x1xf32>
    %cst_12 = arith.constant dense<0.000000e+00> : vector<8x1xf32>
    %12 = vector.multi_reduction <add>, %4, %cst_12 [1] : vector<8x8x1xf32> to vector<8x1xf32>
    %13 = arith.addf %11, %12 : vector<8x1xf32>
    %c0_13 = arith.constant 0 : index
    %c0_14 = arith.constant 0 : index
    %14 = vector.load %arg5[%c0_13, %c0_14] : memref<8x1xf32, #tpu.memory_space<vmem>>, vector<8x1xf32>
    tpu.vector_store %arg5[%c0_13, %c0_14], %13 {strides = array<i32>} : memref<8x1xf32, #tpu.memory_space<vmem>>, vector<8x1xf32>,
    %c0_i32_15 = arith.constant 0 : i32
    %15 = arith.cmpi eq, %arg1, %c0_i32_15 : i32
    %16 = arith.extui %15 : i1 to i32
    %c0_i32_16 = arith.constant 0 : i32
    %17 = arith.cmpi ne, %16, %c0_i32_16 : i32
    scf.if %17 {
      %c0_17 = arith.constant 0 : index
      %c0_18 = arith.constant 0 : index
      %18 = vector.load %arg4[%c0_17, %c0_18] : memref<8x768xf32, #tpu.memory_space<vmem>>, vector<8x768xf32>
      %c0_19 = arith.constant 0 : index
      %c0_20 = arith.constant 0 : index
      %19 = vector.load %arg5[%c0_19, %c0_20] : memref<8x1xf32, #tpu.memory_space<vmem>>, vector<8x1xf32>
      %cst_21 = arith.constant 1.000000e+00 : f32
      %20 = vector.broadcast %cst_21 : f32 to vector<8x1xf32>
      %21 = arith.maximumf %19, %20 : vector<8x1xf32>
      %22 = vector.broadcast %21 : vector<8x1xf32> to vector<8x768xf32>
      %23 = arith.divf %18, %22 : vector<8x768xf32>
      %c0_22 = arith.constant 0 : index
      %c0_23 = arith.constant 0 : index
      %24 = vector.load %arg4[%c0_22, %c0_23] : memref<8x768xf32, #tpu.memory_space<vmem>>, vector<8x768xf32>
      tpu.vector_store %arg4[%c0_22, %c0_23], %23 {strides = array<i32>} : memref<8x768xf32, #tpu.memory_space<vmem>>, vector<8x768xf32>,
    } else {
    }
    return
  }
  func.func @transform_0(%arg0: i32, %arg1: i32) -> (i32, i32, i32) {
    %c0_i32 = arith.constant 0 : i32
    %c0_i32_0 = arith.constant 0 : i32
    return %arg0, %arg1, %c0_i32 : i32, i32, i32
  }
  func.func @transform_1(%arg0: i32, %arg1: i32) -> (i32, i32, i32) {
    %c0_i32 = arith.constant 0 : i32
    %c0_i32_0 = arith.constant 0 : i32
    return %arg0, %arg1, %c0_i32 : i32, i32, i32
  }
  func.func @transform_2(%arg0: i32, %arg1: i32) -> (i32, i32) {
    %c0_i32 = arith.constant 0 : i32
    %c0_i32_0 = arith.constant 0 : i32
    return %arg0, %c0_i32 : i32, i32
  }
}

</mosaic_0001>

<bundles_post_ra>
// kernel: tpu_custom_call.1
= control target key start
LH: loop header
LB: loop body
LE: loop exit
PB: predicated region body
PF: predicated region fallthrough
CT: control target
= control target key end

     0   :  { %7 = vsyncpa [#allocation4], 0  ;;  %s1023_s0 = inlined_call_operand.hbm [shape: f32[8,8,768], index: 0, kind: input, shape index: {}]   ;;  %s1024_s1 = inlined_call_operand.hbm [shape: f32[8,8,1], index: 1, kind: input, shape index: {}]   ;;  %s1025_s2 = inlined_call_operand.hbm [shape: f32[8,768], index: 2, kind: output, shape index: {}]  }
   0x1   :  { %8 = vsyncpa [#allocation7], 0 }
   0x2   :  { %9 = vsyncpa [#allocation5], 0  ;;  %s811_s9 = smov [#allocation3]   ;;  %s739_s13 = scalar_lea.hbm %s1023_s0, 6144 }
   0x3   :  { %s15_s10 = sshll.u32 %s811_s9, 4  ;;  %p740_p0 = scmp.ne.s32.totalorder %s1023_s0, %s739_s13  ;;  %s16_s10 = int_to_ptr.vmem [resolvable:$true] %s15_s10 }
   0x4   :  { %p743_p1 = scmp.lt.u32.totalorder %s739_s13, %s1023_s0 }
   0x6   :  { %p745_p2 = pnand %p743_p1, %p740_p0 }
   0x8   :  { %748 = shalt.err (!%p745_p2)
}
   0x9   :  { %s749_s18 = scalar_lea.vmem %s16_s10, 6144  ;;  %p754_p4 = scmp.lt.s32.totalorder %s16_s10, %s16_s10 }
   0xa   :  { %p750_p3 = scmp.ne.s32.totalorder %s16_s10, %s749_s18  ;;  %p755_p5 = scmp.lt.s32.totalorder %s749_s18, %s749_s18 }
   0xc   :  { %p756_p6 = por %p755_p5, %p754_p4 }
   0xe   :  { %p757_p7 = pnand %p756_p6, %p750_p3 }
  0x10   :  { %760 = shalt.err (!%p757_p7)
}
  0x11   :  { %s812_s19 = smov 768   ;;  %s813_s20 = smov 48  }
  0x12   :  { %21 = dma.hbm_to_vmem [thread:$0]  %s1023_s0, 6144, %s16_s10, [#allocation4], %s812_s19, %s812_s19, %s813_s20  }
  0x13   :  { %s814_s23 = smov [#allocation6]   ;;  %s761_s27 = scalar_lea.hbm %s1024_s1, 1024 }
  0x14   :  { %s27_s24 = sshll.u32 %s814_s23, 4  ;;  %p762_p8 = scmp.ne.s32.totalorder %s1024_s1, %s761_s27  ;;  %s28_s24 = int_to_ptr.vmem [resolvable:$true] %s27_s24 }
  0x15   :  { %p765_p9 = scmp.lt.u32.totalorder %s761_s27, %s1024_s1 }
  0x17   :  { %p767_p10 = pnand %p765_p9, %p762_p8 }
  0x19   :  { %770 = shalt.err (!%p767_p10)
}
  0x1a   :  { %s771_s4 = scalar_lea.vmem %s28_s24, 1024  ;;  %p776_p12 = scmp.lt.s32.totalorder %s28_s24, %s28_s24 }
  0x1b   :  { %p772_p11 = scmp.ne.s32.totalorder %s28_s24, %s771_s4  ;;  %p777_p13 = scmp.lt.s32.totalorder %s771_s4, %s771_s4 }
  0x1d   :  { %p778_p0 = por %p777_p13, %p776_p12 }
  0x1f   :  { %p779_p1 = pnand %p778_p0, %p772_p11 }
  0x21   :  { %782 = shalt.err (!%p779_p1)
}
  0x22   :  { %s815_s0 = smov 128   ;;  %s816_s5 = smov 8  }
  0x23   :  { %33 = dma.hbm_to_vmem [thread:$0]  %s1024_s1, 1024, %s28_s24, [#allocation7], %s815_s0, %s815_s0, %s816_s5  }
  0x24   :  { %805 = dma.done.wait [#allocation4], 6144  }
  0x25   :  { %806 = vsyncadd [#allocation4], 4294961152 }
  0x26   :  { %807 = dma.done.wait [#allocation7], 1024  }
  0x27   :  { %808 = vsyncadd [#allocation7], 4294966272  ;;  %v817_v0 = vmov 0   ;;  %vm50_vm0 = vcmask 7168   ;;  %v818_v1 = vmov 0.0   ;;  %v102_v2 = vld [vmem:[#allocation6 + $0x10] sm:$0xff] }
  0x28   :  { %736 = vset.pattern.permute.xlu1 %v817_v0  ;;  %735 = vset.pattern.permute.xlu0 %v817_v0  ;;  %51 = vst.msk [vmem:[#allocation2] sm:$0xff] %vm50_vm0, %v818_v1  ;;  %v100_v3 = vld [vmem:[#allocation6] sm:$0xff]  ;;  %v103_v4 = vld [vmem:[#allocation6 + $0x18] sm:$0xff]  ;;  %v621_v5 = vsel %vm50_vm0, %v102_v2, 0.0  ;;  %v101_v8 = vld [vmem:[#allocation6 + $0x8] sm:$0xff]  ;;  %vm538_vm1 = vcmask 1041409  }
  0x29   :  { %126 = vperm.xlu1 %736, %v102_v2   ;;  %116 = vperm.xlu0 %735, %v100_v3   ;;  %v607_v6 = vsel %vm50_vm0, %v100_v3, 0.0  ;;  %v628_v7 = vsel %vm50_vm0, %v103_v4, 0.0  ;;  %v105_v9 = vld [vmem:[#allocation6 + $0x28] sm:$0xff]  ;;  %v104_v10 = vld [vmem:[#allocation6 + $0x20] sm:$0xff]  ;;  %v622_v11 = vrot.slane %v621_v5, 4  ;;  %v614_v14 = vsel %vm50_vm0, %v101_v8, 0.0 }
  0x2a   :  { %v608_v12 = vrot.slane %v607_v6, 4  ;;  %v629_v13 = vrot.slane %v628_v7, 4  ;;  %v107_v15 = vld [vmem:[#allocation6 + $0x38] sm:$0xff]  ;;  %v106_v16 = vld [vmem:[#allocation6 + $0x30] sm:$0xff]  ;;  %v615_v17 = vrot.slane %v614_v14, 4  ;;  %v642_v18 = vsel %vm50_vm0, %v105_v9, 0.0 }
  0x2b   :  { %v635_v19 = vsel %vm50_vm0, %v104_v10, 0.0  ;;  %v656_v20 = vsel %vm50_vm0, %v107_v15, 0.0  ;;  %v623_v21 = vadd.f32 %v622_v11, %v621_v5  ;;  %v643_v24 = vrot.slane %v642_v18, 4  ;;  %s819_s1 = smov [#allocation8]  }
  0x2c   :  { %v609_v22 = vadd.f32 %v608_v12, %v607_v6  ;;  %v630_v23 = vadd.f32 %v629_v13, %v628_v7  ;;  %vm540_vm2 = vcmask 1042434   ;;  %v616_v25 = vadd.f32 %v615_v17, %v614_v14  ;;  %v64_v13 = vld [vmem:[#allocation3 + $0x60] sm:$0xff]  ;;  %v65_v14 = vld [vmem:[#allocation3 + $0x68] sm:$0xff]  ;;  %s716_s8 = sshll.u32 %s819_s1, 4  ;;  %s717_s8 = int_to_ptr.vmem [resolvable:$true] %s716_s8 }
  0x2d   :  { %131 = vperm.xlu1 %736, %v103_v4   ;;  %121 = vperm.xlu0 %735, %v101_v8   ;;  %v636_v26 = vrot.slane %v635_v19, 4  ;;  %v657_v27 = vrot.slane %v656_v20, 4  ;;  %v649_v28 = vsel %vm50_vm0, %v106_v16, 0.0  ;;  %v624_v29 = vrot.slane %v623_v21, 2  ;;  %v68_v17 = vld [vmem:[#allocation3 + $0x80] sm:$0xff]  ;;  %s783_s9 = scalar_lea.vmem %s717_s8, 768  ;;  %p788_p3 = scmp.lt.s32.totalorder %s717_s8, %s717_s8 }
  0x2e   :  { %v610_v30 = vrot.slane %v609_v22, 2  ;;  %v631_v31 = vrot.slane %v630_v23, 2  ;;  %v644_v32 = vadd.f32 %v643_v24, %v642_v18  ;;  %v617_v33 = vrot.slane %v616_v25, 2  ;;  %v69_v18 = vld [vmem:[#allocation3 + $0x88] sm:$0xff]  ;;  %v52_v24 = vld [vmem:[#allocation3] sm:$0xff]  ;;  %p784_p2 = scmp.ne.s32.totalorder %s717_s8, %s783_s9  ;;  %p789_p4 = scmp.lt.s32.totalorder %s783_s9, %s783_s9 }
  0x2f   :  { %v637_v34 = vadd.f32 %v636_v26, %v635_v19  ;;  %v658_v35 = vadd.f32 %v657_v27, %v656_v20  ;;  %v650_v36 = vrot.slane %v649_v28, 4  ;;  %v625_v37 = vadd.f32 %v624_v29, %v623_v21  ;;  %v605_v6 = vld [vmem:[#allocation2] sm:$0xff] }
  0x30   :  { %v611_v38 = vadd.f32 %v610_v30, %v609_v22  ;;  %v632_v39 = vadd.f32 %v631_v31, %v630_v23  ;;  %v645_v40 = vrot.slane %v644_v32, 2  ;;  %v618_v41 = vadd.f32 %v617_v33, %v616_v25  ;;  %v53_v25 = vld [vmem:[#allocation3 + $0x8] sm:$0xff]  ;;  %v54_v33 = vld [vmem:[#allocation3 + $0x10] sm:$0xff]  ;;  %p790_p5 = por %p789_p4, %p788_p3 }
  0x31   :  { %141 = vperm.xlu1 %736, %v105_v9   ;;  %v638_v42 = vrot.slane %v637_v34, 2  ;;  %136 = vperm.xlu0 %735, %v104_v10   ;;  %v659_v43 = vrot.slane %v658_v35, 2  ;;  %v651_v44 = vadd.f32 %v650_v36, %v649_v28  ;;  %v626_v45 = vrot.slane %v625_v37, 1 }
  0x32   :  { %v612_v46 = vrot.slane %v611_v38, 1  ;;  %v633_v47 = vrot.slane %v632_v39, 1  ;;  %v646_v48 = vadd.f32 %v645_v40, %v644_v32  ;;  %v619_v49 = vrot.slane %v618_v41, 1  ;;  %p791_p6 = pnand %p790_p5, %p784_p2 }
  0x33   :  { %v639_v50 = vadd.f32 %v638_v42, %v637_v34  ;;  %v660_v51 = vadd.f32 %v659_v43, %v658_v35  ;;  %v652_v52 = vrot.slane %v651_v44, 2  ;;  %v627_v53 = vadd.f32 %v626_v45, %v625_v37  ;;  %v55_v34 = vld [vmem:[#allocation3 + $0x18] sm:$0xff] }
  0x34   :  { %v613_v54 = vadd.f32 %v612_v46, %v611_v38  ;;  %v634_v55 = vadd.f32 %v633_v47, %v632_v39  ;;  %v647_v56 = vrot.slane %v646_v48, 1  ;;  %v620_v57 = vadd.f32 %v619_v49, %v618_v41 }
  0x35   :  { %v640_v58 = vrot.slane %v639_v50, 1  ;;  %v661_v59 = vrot.slane %v660_v51, 1  ;;  %151 = vperm.xlu1 %736, %v107_v15   ;;  %v653_v60 = vadd.f32 %v652_v52, %v651_v44  ;;  %146 = vperm.xlu0 %735, %v106_v16   ;;  %vm542_vm3 = vcmask 1043459   ;;  %v66_v15 = vld [vmem:[#allocation3 + $0x70] sm:$0xff]  ;;  %v67_v16 = vld [vmem:[#allocation3 + $0x78] sm:$0xff] }
  0x36   :  { %vm544_vm4 = vcmask 1044484   ;;  %v671_v61 = vsel %vm538_vm1, %v620_v57, %v613_v54  ;;  %v648_v62 = vadd.f32 %v647_v56, %v646_v48  ;;  %vm546_vm5 = vcmask 1045509   ;;  %v57_v54 = vld [vmem:[#allocation3 + $0x28] sm:$0xff] }
  0x37   :  { %v641_v63 = vadd.f32 %v640_v58, %v639_v50  ;;  %v654_v0 = vrot.slane %v653_v60, 1  ;;  %v672_v1 = vsel %vm540_vm2, %v627_v53, %v671_v61  ;;  %v662_v3 = vadd.f32 %v661_v59, %v660_v51  ;;  %v56_v53 = vld [vmem:[#allocation3 + $0x20] sm:$0xff] }
  0x38   :  { %v673_v2 = vsel %vm542_vm3, %v634_v55, %v672_v1  ;;  %vm548_vm6 = vcmask 1046534   ;;  %vm550_vm7 = vcmask 1047559  }
  0x39   :  { %v655_v4 = vadd.f32 %v654_v0, %v653_v60  ;;  %v674_v5 = vsel %vm544_vm4, %v641_v63, %v673_v2 }
  0x3a   :  { %v675_v7 = vsel %vm546_vm5, %v648_v62, %v674_v5 }
  0x3b   :  { %v676_v8 = vsel %vm548_vm6, %v655_v4, %v675_v7 }
  0x3c   :  { %v677_v9 = vsel %vm550_vm7, %v662_v3, %v676_v8 }
  0x3d   :  { %v679_v10 = vadd.f32 %v677_v9, %v605_v6 }
  0x3f   :  { %680 = vst.msk [vmem:[#allocation2] sm:$0xff] %vm50_vm0, %v679_v10  ;;  %v70_v10 = vld [vmem:[#allocation3 + $0x90] sm:$0xff] }
  0x46   :  { %v690_v11 = vld [vmem:[#allocation2] sm:$0xff] }
  0x47   :  { %v691_v12 = vmax.f32 %v690_v11, 1.0  ;;  %v71_v11 = vld [vmem:[#allocation3 + $0x98] sm:$0xff] }
  0x49   :  { %694 = vperm.xlu0 %735, %v691_v12  }
  0xa8   :  { %v127_v19 = vpop.permute.xlu1 %126  ;;  %v117_v32 = vpop.permute.xlu0 %116 }
  0xa9   :  { %v166_v20 = vmul.f32 %v127_v19, %v64_v13  ;;  %v167_v21 = vmul.f32 %v127_v19, %v65_v14  ;;  %v168_v22 = vmul.f32 %v127_v19, %v66_v15  ;;  %v169_v23 = vmul.f32 %v127_v19, %v67_v16 }
  0xaa   :  { %v170_v26 = vmul.f32 %v127_v19, %v68_v17  ;;  %v171_v27 = vmul.f32 %v127_v19, %v69_v18  ;;  %v154_v37 = vmul.f32 %v117_v32, %v52_v24  ;;  %v155_v38 = vmul.f32 %v117_v32, %v53_v25 }
  0xab   :  { %v274_v28 = vrot.slane %v166_v20, 4  ;;  %v280_v29 = vrot.slane %v167_v21, 4  ;;  %v286_v30 = vrot.slane %v168_v22, 4  ;;  %v292_v31 = vrot.slane %v169_v23, 4 }
  0xac   :  { %v298_v35 = vrot.slane %v170_v26, 4  ;;  %v304_v36 = vrot.slane %v171_v27, 4  ;;  %v156_v45 = vmul.f32 %v117_v32, %v54_v33  ;;  %v157_v46 = vmul.f32 %v117_v32, %v55_v34 }
  0xad   :  { %v275_v39 = vadd.f32 %v274_v28, %v166_v20  ;;  %v281_v40 = vadd.f32 %v280_v29, %v167_v21  ;;  %v287_v41 = vadd.f32 %v286_v30, %v168_v22  ;;  %v293_v42 = vadd.f32 %v292_v31, %v169_v23  ;;  %v132_v20 = vpop.permute.xlu1 %131  ;;  %v72_v21 = vld [vmem:[#allocation3 + $0xa0] sm:$0xff]  ;;  %v73_v22 = vld [vmem:[#allocation3 + $0xa8] sm:$0xff] }
  0xae   :  { %v299_v43 = vadd.f32 %v298_v35, %v170_v26  ;;  %v305_v44 = vadd.f32 %v304_v36, %v171_v27  ;;  %v202_v55 = vrot.slane %v154_v37, 4  ;;  %v208_v56 = vrot.slane %v155_v38, 4 }
  0xaf   :  { %v276_v47 = vrot.slane %v275_v39, 2  ;;  %v282_v48 = vrot.slane %v281_v40, 2  ;;  %v288_v49 = vrot.slane %v287_v41, 2  ;;  %v294_v50 = vrot.slane %v293_v42, 2 }
  0xb0   :  { %v300_v51 = vrot.slane %v299_v43, 2  ;;  %v306_v52 = vrot.slane %v305_v44, 2  ;;  %v203_v63 = vadd.f32 %v202_v55, %v154_v37  ;;  %v209_v0 = vadd.f32 %v208_v56, %v155_v38 }
  0xb1   :  { %v277_v57 = vadd.f32 %v276_v47, %v275_v39  ;;  %v283_v58 = vadd.f32 %v282_v48, %v281_v40  ;;  %v289_v59 = vadd.f32 %v288_v49, %v287_v41  ;;  %v295_v60 = vadd.f32 %v294_v50, %v293_v42  ;;  %v74_v41 = vld [vmem:[#allocation3 + $0xb0] sm:$0xff]  ;;  %v75_v42 = vld [vmem:[#allocation3 + $0xb8] sm:$0xff] }
  0xb2   :  { %v301_v61 = vadd.f32 %v300_v51, %v299_v43  ;;  %v307_v62 = vadd.f32 %v306_v52, %v305_v44  ;;  %v158_v3 = vmul.f32 %v117_v32, %v56_v53  ;;  %v159_v4 = vmul.f32 %v117_v32, %v57_v54 }
  0xb3   :  { %v278_v1 = vrot.slane %v277_v57, 1  ;;  %v284_v2 = vrot.slane %v283_v58, 1  ;;  %v290_v5 = vrot.slane %v289_v59, 1  ;;  %v204_v6 = vrot.slane %v203_v63, 2 }
  0xb4   :  { %v210_v7 = vrot.slane %v209_v0, 2  ;;  %v296_v8 = vrot.slane %v295_v60, 1  ;;  %v302_v9 = vrot.slane %v301_v61, 1  ;;  %v308_v14 = vrot.slane %v307_v62, 1 }
  0xb5   :  { %v876_v12 = vadd.f32 %v278_v1, %v277_v57  ;;  %v878_v13 = vadd.f32 %v284_v2, %v283_v58  ;;  %v205_v15 = vadd.f32 %v204_v6, %v203_v63  ;;  %v214_v16 = vrot.slane %v156_v45, 4  ;;  %v58_v63 = vld [vmem:[#allocation3 + $0x30] sm:$0xff] }
  0xb6   :  { %v220_v17 = vrot.slane %v157_v46, 4  ;;  %v226_v18 = vrot.slane %v158_v3, 4  ;;  %v232_v19 = vrot.slane %v159_v4, 4  ;;  %v880_v23 = vadd.f32 %v290_v5, %v289_v59 }
  0xb7   :  { %v211_v24 = vadd.f32 %v210_v7, %v209_v0  ;;  %v172_v25 = vmul.f32 %v132_v20, %v70_v10  ;;  %v173_v26 = vmul.f32 %v132_v20, %v71_v11  ;;  %v215_v27 = vadd.f32 %v214_v16, %v156_v45 }
  0xb8   :  { %v221_v28 = vadd.f32 %v220_v17, %v157_v46  ;;  %v227_v29 = vadd.f32 %v226_v18, %v158_v3  ;;  %v233_v30 = vadd.f32 %v232_v19, %v159_v4  ;;  %v882_v31 = vadd.f32 %v296_v8, %v295_v60  ;;  %v59_v4 = vld [vmem:[#allocation3 + $0x38] sm:$0xff]  ;;  %v60_v8 = vld [vmem:[#allocation3 + $0x40] sm:$0xff]  ;;  %v62_v19 = vld [vmem:[#allocation3 + $0x50] sm:$0xff] }
  0xb9   :  { %v206_v32 = vrot.slane %v205_v15, 1  ;;  %v174_v33 = vmul.f32 %v132_v20, %v72_v21  ;;  %v175_v34 = vmul.f32 %v132_v20, %v73_v22  ;;  %v216_v35 = vrot.slane %v215_v27, 2 }
  0xba   :  { %v222_v36 = vrot.slane %v221_v28, 2  ;;  %v228_v37 = vrot.slane %v227_v29, 2  ;;  %v234_v38 = vrot.slane %v233_v30, 2  ;;  %v884_v39 = vadd.f32 %v302_v9, %v301_v61  ;;  %v122_v61 = vpop.permute.xlu0 %121  ;;  %v61_v9 = vld [vmem:[#allocation3 + $0x48] sm:$0xff] }
  0xbb   :  { %v212_v40 = vrot.slane %v211_v24, 1  ;;  %v310_v43 = vrot.slane %v172_v25, 4  ;;  %v316_v44 = vrot.slane %v173_v26, 4  ;;  %v217_v45 = vadd.f32 %v216_v35, %v215_v27 }
  0xbc   :  { %v223_v46 = vadd.f32 %v222_v36, %v221_v28  ;;  %v229_v47 = vadd.f32 %v228_v37, %v227_v29  ;;  %v235_v48 = vadd.f32 %v234_v38, %v233_v30  ;;  %v322_v51 = vrot.slane %v174_v33, 4 }
  0xbd   :  { %v311_v49 = vadd.f32 %v310_v43, %v172_v25  ;;  %v317_v50 = vadd.f32 %v316_v44, %v173_v26  ;;  %v328_v52 = vrot.slane %v175_v34, 4  ;;  %v886_v53 = vadd.f32 %v308_v14, %v307_v62 }
  0xbe   :  { %v888_v54 = vadd.f32 %v206_v32, %v205_v15  ;;  %v176_v55 = vmul.f32 %v132_v20, %v74_v41  ;;  %v177_v56 = vmul.f32 %v132_v20, %v75_v42  ;;  %v323_v59 = vadd.f32 %v322_v51, %v174_v33  ;;  %v63_v20 = vld [vmem:[#allocation3 + $0x58] sm:$0xff] }
  0xbf   :  { %v312_v57 = vrot.slane %v311_v49, 2  ;;  %v318_v58 = vrot.slane %v317_v50, 2  ;;  %v329_v60 = vadd.f32 %v328_v52, %v175_v34  ;;  %v890_v0 = vadd.f32 %v212_v40, %v211_v24 }
  0xc0   :  { %v218_v1 = vrot.slane %v217_v45, 1  ;;  %v224_v2 = vrot.slane %v223_v46, 1  ;;  %v230_v3 = vrot.slane %v229_v47, 1  ;;  %v236_v5 = vrot.slane %v235_v48, 1 }
  0xc1   :  { %v313_v6 = vadd.f32 %v312_v57, %v311_v49  ;;  %v319_v62 = vadd.f32 %v318_v58, %v317_v50  ;;  %v324_v7 = vrot.slane %v323_v59, 2  ;;  %v330_v10 = vrot.slane %v329_v60, 2 }
  0xc2   :  { %v334_v11 = vrot.slane %v176_v55, 4  ;;  %v340_v14 = vrot.slane %v177_v56, 4  ;;  %v160_v15 = vmul.f32 %v122_v61, %v58_v63  ;;  %v161_v21 = vmul.f32 %v122_v61, %v59_v4 }
  0xc3   :  { %v314_v16 = vrot.slane %v313_v6, 1  ;;  %v320_v17 = vrot.slane %v319_v62, 1  ;;  %v325_v18 = vadd.f32 %v324_v7, %v323_v59  ;;  %v162_v25 = vmul.f32 %v122_v61, %v60_v8 }
  0xc4   :  { %v335_v22 = vadd.f32 %v334_v11, %v176_v55  ;;  %v341_v24 = vadd.f32 %v340_v14, %v177_v56  ;;  %v163_v26 = vmul.f32 %v122_v61, %v61_v9  ;;  %v892_v27 = vadd.f32 %v218_v1, %v217_v45 }
  0xc5   :  { %v894_v28 = vadd.f32 %v224_v2, %v223_v46  ;;  %v896_v29 = vadd.f32 %v230_v3, %v229_v47  ;;  %v898_v30 = vadd.f32 %v236_v5, %v235_v48  ;;  %v164_v34 = vmul.f32 %v122_v61, %v62_v19  ;;  %v142_v5 = vpop.permute.xlu1 %141 }
  0xc6   :  { %v336_v32 = vrot.slane %v335_v22, 2  ;;  %v342_v33 = vrot.slane %v341_v24, 2  ;;  %v165_v35 = vmul.f32 %v122_v61, %v63_v20  ;;  %v900_v36 = vadd.f32 %v314_v16, %v313_v6  ;;  %v82_v6 = vld [vmem:[#allocation3 + $0xf0] sm:$0xff] }
  0xc7   :  { %v331_v37 = vadd.f32 %v330_v10, %v329_v60  ;;  %v238_v38 = vrot.slane %v160_v15, 4  ;;  %v244_v40 = vrot.slane %v161_v21, 4  ;;  %v902_v41 = vadd.f32 %v320_v17, %v319_v62  ;;  %v83_v62 = vld [vmem:[#allocation3 + $0xf8] sm:$0xff]  ;;  %v84_v17 = vld [vmem:[#allocation3 + $0x100] sm:$0xff] }
  0xc8   :  { %v326_v42 = vrot.slane %v325_v18, 1  ;;  %v250_v43 = vrot.slane %v162_v25, 4  ;;  %v256_v44 = vrot.slane %v163_v26, 4  ;;  %v262_v47 = vrot.slane %v164_v34, 4 }
  0xc9   :  { %v239_v45 = vadd.f32 %v238_v38, %v160_v15  ;;  %v245_v46 = vadd.f32 %v244_v40, %v161_v21  ;;  %v268_v49 = vrot.slane %v165_v35, 4  ;;  %v337_v48 = vadd.f32 %v336_v32, %v335_v22  ;;  %v86_v21 = vld [vmem:[#allocation3 + $0x110] sm:$0xff]  ;;  %v87_v22 = vld [vmem:[#allocation3 + $0x118] sm:$0xff] }
  0xca   :  { %v343_v50 = vadd.f32 %v342_v33, %v341_v24  ;;  %v251_v51 = vadd.f32 %v250_v43, %v162_v25  ;;  %v257_v52 = vadd.f32 %v256_v44, %v163_v26  ;;  %v263_v57 = vadd.f32 %v262_v47, %v164_v34 }
  0xcb   :  { %v240_v55 = vrot.slane %v239_v45, 2  ;;  %v246_v56 = vrot.slane %v245_v46, 2  ;;  %v269_v58 = vadd.f32 %v268_v49, %v165_v35  ;;  %v904_v59 = vadd.f32 %v326_v42, %v325_v18  ;;  %v85_v18 = vld [vmem:[#allocation3 + $0x108] sm:$0xff] }
  0xcc   :  { %v332_v60 = vrot.slane %v331_v37, 1  ;;  %v252_v61 = vrot.slane %v251_v51, 2  ;;  %v258_v63 = vrot.slane %v257_v52, 2  ;;  %v264_v3 = vrot.slane %v263_v57, 2 }
  0xcd   :  { %v241_v1 = vadd.f32 %v240_v55, %v239_v45  ;;  %v247_v2 = vadd.f32 %v246_v56, %v245_v46  ;;  %v270_v4 = vrot.slane %v269_v58, 2  ;;  %v338_v7 = vrot.slane %v337_v48, 1 }
  0xce   :  { %v344_v8 = vrot.slane %v343_v50, 1  ;;  %v253_v9 = vadd.f32 %v252_v61, %v251_v51  ;;  %v259_v10 = vadd.f32 %v258_v63, %v257_v52  ;;  %v265_v15 = vadd.f32 %v264_v3, %v263_v57  ;;  %v137_v63 = vpop.permute.xlu0 %136 }
  0xcf   :  { %v242_v11 = vrot.slane %v241_v1, 1  ;;  %v248_v14 = vrot.slane %v247_v2, 1  ;;  %v271_v16 = vadd.f32 %v270_v4, %v269_v58  ;;  %v184_v24 = vmul.f32 %v142_v5, %v82_v6 }
  0xd0   :  { %v254_v19 = vrot.slane %v253_v9, 1  ;;  %v260_v20 = vrot.slane %v259_v10, 1  ;;  %v185_v25 = vmul.f32 %v142_v5, %v83_v62  ;;  %v266_v33 = vrot.slane %v265_v15, 1  ;;  %v78_v62 = vld [vmem:[#allocation3 + $0xd0] sm:$0xff] }
  0xd1   :  { %v243_v26 = vadd.f32 %v242_v11, %v241_v1  ;;  %v249_v32 = vadd.f32 %v248_v14, %v247_v2  ;;  %v272_v34 = vrot.slane %v271_v16, 1  ;;  %v186_v40 = vmul.f32 %v142_v5, %v84_v17  ;;  %v77_v1 = vld [vmem:[#allocation3 + $0xc8] sm:$0xff] }
  0xd2   :  { %v255_v35 = vadd.f32 %v254_v19, %v253_v9  ;;  %v261_v38 = vadd.f32 %v260_v20, %v259_v10  ;;  %v187_v42 = vmul.f32 %v142_v5, %v85_v18  ;;  %v188_v45 = vmul.f32 %v142_v5, %v86_v21  ;;  %v80_v19 = vld [vmem:[#allocation3 + $0xe0] sm:$0xff]  ;;  %v81_v20 = vld [vmem:[#allocation3 + $0xe8] sm:$0xff] }
  0xd3   :  { %v539_v43 = vsel %vm538_vm1, %v243_v26, %v888_v54  ;;  %v552_v44 = vsel %vm538_vm1, %v249_v32, %v890_v0  ;;  %v189_v46 = vmul.f32 %v142_v5, %v87_v22  ;;  %v910_v47 = vadd.f32 %v332_v60, %v331_v37 }
  0xd4   :  { %v912_v49 = vadd.f32 %v338_v7, %v337_v48  ;;  %v267_v51 = vadd.f32 %v266_v33, %v265_v15  ;;  %v559_v52 = vsel %vm538_vm1, %v255_v35, %v892_v27  ;;  %v916_v55 = vadd.f32 %v344_v8, %v343_v50 }
  0xd5   :  { %v273_v56 = vadd.f32 %v272_v34, %v271_v16  ;;  %v920_v57 = vsel %vm540_vm2, %v876_v12, %v539_v43  ;;  %v566_v54 = vsel %vm538_vm1, %v261_v38, %v894_v28  ;;  %v926_v0 = vsel %vm540_vm2, %v878_v13, %v552_v44  ;;  %v76_v12 = vld [vmem:[#allocation3 + $0xc0] sm:$0xff] }
  0xd6   :  { %v930_v37 = vsel %vm540_vm2, %v880_v23, %v559_v52  ;;  %v382_v48 = vrot.slane %v184_v24, 4  ;;  %v388_v27 = vrot.slane %v185_v25, 4  ;;  %v394_v50 = vrot.slane %v186_v40, 4 }
  0xd7   :  { %v400_v58 = vrot.slane %v187_v42, 4  ;;  %v406_v60 = vrot.slane %v188_v45, 4  ;;  %v412_v61 = vrot.slane %v189_v46, 4  ;;  %v934_v28 = vsel %vm540_vm2, %v882_v31, %v566_v54  ;;  %v79_v31 = vld [vmem:[#allocation3 + $0xd8] sm:$0xff] }
  0xd8   :  { %v573_v13 = vsel %vm538_vm1, %v267_v51, %v896_v29  ;;  %v383_v2 = vadd.f32 %v382_v48, %v184_v24  ;;  %v389_v3 = vadd.f32 %v388_v27, %v185_v25  ;;  %v395_v23 = vadd.f32 %v394_v50, %v186_v40 }
  0xd9   :  { %v401_v4 = vadd.f32 %v400_v58, %v187_v42  ;;  %v407_v5 = vadd.f32 %v406_v60, %v188_v45  ;;  %v413_v6 = vadd.f32 %v412_v61, %v189_v46  ;;  %v178_v9 = vmul.f32 %v137_v63, %v76_v12 }
  0xda   :  { %v384_v7 = vrot.slane %v383_v2, 2  ;;  %v390_v8 = vrot.slane %v389_v3, 2  ;;  %v179_v10 = vmul.f32 %v137_v63, %v77_v1  ;;  %v396_v11 = vrot.slane %v395_v23, 2 }
  0xdb   :  { %v402_v14 = vrot.slane %v401_v4, 2  ;;  %v408_v15 = vrot.slane %v407_v5, 2  ;;  %v414_v16 = vrot.slane %v413_v6, 2  ;;  %v580_v17 = vsel %vm538_vm1, %v273_v56, %v898_v30 }
  0xdc   :  { %v385_v29 = vadd.f32 %v384_v7, %v383_v2  ;;  %v391_v18 = vadd.f32 %v390_v8, %v389_v3  ;;  %v180_v21 = vmul.f32 %v137_v63, %v78_v62  ;;  %v397_v22 = vadd.f32 %v396_v11, %v395_v23  ;;  %v152_v8 = vpop.permute.xlu1 %151 }
  0xdd   :  { %v403_v24 = vadd.f32 %v402_v14, %v401_v4  ;;  %v409_v25 = vadd.f32 %v408_v15, %v407_v5  ;;  %v415_v26 = vadd.f32 %v414_v16, %v413_v6  ;;  %v181_v33 = vmul.f32 %v137_v63, %v79_v31 }
  0xde   :  { %v386_v32 = vrot.slane %v385_v29, 1  ;;  %v346_v34 = vrot.slane %v178_v9, 4  ;;  %v352_v35 = vrot.slane %v179_v10, 4  ;;  %v392_v38 = vrot.slane %v391_v18, 1 }
  0xdf   :  { %v398_v40 = vrot.slane %v397_v22, 1  ;;  %v182_v42 = vmul.f32 %v137_v63, %v80_v19  ;;  %v183_v43 = vmul.f32 %v137_v63, %v81_v20  ;;  %v574_v30 = vsel %vm540_vm2, %v884_v39, %v573_v13  ;;  %v96_v19 = vld [vmem:[#allocation3 + $0x160] sm:$0xff]  ;;  %v97_v20 = vld [vmem:[#allocation3 + $0x168] sm:$0xff] }
  0xe0   :  { %v581_v44 = vsel %vm540_vm2, %v886_v53, %v580_v17  ;;  %v347_v45 = vadd.f32 %v346_v34, %v178_v9  ;;  %v353_v46 = vadd.f32 %v352_v35, %v179_v10  ;;  %v944_v51 = vadd.f32 %v386_v32, %v385_v29  ;;  %v94_v9 = vld [vmem:[#allocation3 + $0x150] sm:$0xff]  ;;  %v95_v10 = vld [vmem:[#allocation3 + $0x158] sm:$0xff] }
  0xe1   :  { %v404_v52 = vrot.slane %v403_v24, 1  ;;  %v410_v56 = vrot.slane %v409_v25, 1  ;;  %v416_v54 = vrot.slane %v415_v26, 1  ;;  %v358_v50 = vrot.slane %v180_v21, 4 }
  0xe2   :  { %v348_v48 = vrot.slane %v347_v45, 2  ;;  %v354_v27 = vrot.slane %v353_v46, 2  ;;  %v364_v58 = vrot.slane %v181_v33, 4  ;;  %v946_v60 = vadd.f32 %v392_v38, %v391_v18 }
  0xe3   :  { %v948_v61 = vadd.f32 %v398_v40, %v397_v22  ;;  %v370_v63 = vrot.slane %v182_v42, 4  ;;  %v376_v39 = vrot.slane %v183_v43, 4  ;;  %v359_v53 = vadd.f32 %v358_v50, %v180_v21 }
  0xe4   :  { %v349_v12 = vadd.f32 %v348_v48, %v347_v45  ;;  %v355_v1 = vadd.f32 %v354_v27, %v353_v46  ;;  %v365_v13 = vadd.f32 %v364_v58, %v181_v33  ;;  %v950_v2 = vadd.f32 %v404_v52, %v403_v24  ;;  %v98_v24 = vld [vmem:[#allocation3 + $0x170] sm:$0xff] }
  0xe5   :  { %v952_v3 = vadd.f32 %v410_v56, %v409_v25  ;;  %v371_v23 = vadd.f32 %v370_v63, %v182_v42  ;;  %v377_v4 = vadd.f32 %v376_v39, %v183_v43  ;;  %v360_v62 = vrot.slane %v359_v53, 2  ;;  %v99_v25 = vld [vmem:[#allocation3 + $0x178] sm:$0xff]  ;;  %v147_v63 = vpop.permute.xlu0 %146  ;;  %v88_v39 = vld [vmem:[#allocation3 + $0x120] sm:$0xff] }
  0xe6   :  { %v350_v5 = vrot.slane %v349_v12, 1  ;;  %v356_v6 = vrot.slane %v355_v1, 1  ;;  %v366_v7 = vrot.slane %v365_v13, 2  ;;  %v954_v11 = vadd.f32 %v416_v54, %v415_v26 }
  0xe7   :  { %v372_v14 = vrot.slane %v371_v23, 2  ;;  %v378_v15 = vrot.slane %v377_v4, 2  ;;  %v543_v16 = vsel %vm542_vm3, %v900_v36, %v920_v57  ;;  %v361_v31 = vadd.f32 %v360_v62, %v359_v53 }
  0xe8   :  { %v367_v17 = vadd.f32 %v366_v7, %v365_v13  ;;  %v554_v29 = vsel %vm542_vm3, %v902_v41, %v926_v0  ;;  %v561_v18 = vsel %vm542_vm3, %v904_v59, %v930_v37  ;;  %v196_v26 = vmul.f32 %v152_v8, %v94_v9  ;;  %v90_v7 = vld [vmem:[#allocation3 + $0x130] sm:$0xff] }
  0xe9   :  { %v373_v21 = vadd.f32 %v372_v14, %v371_v23  ;;  %v379_v22 = vadd.f32 %v378_v15, %v377_v4  ;;  %v197_v32 = vmul.f32 %v152_v8, %v95_v10  ;;  %v351_v33 = vadd.f32 %v350_v5, %v349_v12  ;;  %v89_v12 = vld [vmem:[#allocation3 + $0x128] sm:$0xff]  ;;  %v92_v14 = vld [vmem:[#allocation3 + $0x140] sm:$0xff] }
  0xea   :  { %v357_v36 = vadd.f32 %v356_v6, %v355_v1  ;;  %v362_v57 = vrot.slane %v361_v31, 1  ;;  %v568_v34 = vsel %vm542_vm3, %v910_v47, %v934_v28  ;;  %v368_v41 = vrot.slane %v367_v17, 1  ;;  %v93_v15 = vld [vmem:[#allocation3 + $0x148] sm:$0xff] }
  0xeb   :  { %v374_v0 = vrot.slane %v373_v21, 1  ;;  %v198_v35 = vmul.f32 %v152_v8, %v96_v19  ;;  %v199_v38 = vmul.f32 %v152_v8, %v97_v20  ;;  %v575_v59 = vsel %vm542_vm3, %v912_v49, %v574_v30 }
  0xec   :  { %v582_v37 = vsel %vm542_vm3, %v916_v55, %v581_v44  ;;  %v200_v40 = vmul.f32 %v152_v8, %v98_v24  ;;  %v201_v42 = vmul.f32 %v152_v8, %v99_v25  ;;  %v363_v43 = vadd.f32 %v362_v57, %v361_v31  ;;  %v91_v8 = vld [vmem:[#allocation3 + $0x138] sm:$0xff] }
  0xed   :  { %v380_v45 = vrot.slane %v379_v22, 1  ;;  %v454_v46 = vrot.slane %v196_v26, 4  ;;  %v460_v52 = vrot.slane %v197_v32, 4  ;;  %v973_v56 = vsel %vm544_vm4, %v351_v33, %v543_v16 }
  0xee   :  { %v976_v47 = vsel %vm544_vm4, %v357_v36, %v554_v29  ;;  %v466_v28 = vrot.slane %v198_v35, 4  ;;  %v472_v54 = vrot.slane %v199_v38, 4  ;;  %v369_v48 = vadd.f32 %v368_v41, %v367_v17 }
  0xef   :  { %v375_v27 = vadd.f32 %v374_v0, %v373_v21  ;;  %v455_v49 = vadd.f32 %v454_v46, %v196_v26  ;;  %v461_v30 = vadd.f32 %v460_v52, %v197_v32  ;;  %v478_v44 = vrot.slane %v200_v40, 4 }
  0xf0   :  { %v467_v50 = vadd.f32 %v466_v28, %v198_v35  ;;  %v473_v55 = vadd.f32 %v472_v54, %v199_v38  ;;  %v484_v58 = vrot.slane %v201_v42, 4  ;;  %v381_v1 = vadd.f32 %v380_v45, %v379_v22 }
  0xf1   :  { %v979_v53 = vsel %vm544_vm4, %v363_v43, %v561_v18  ;;  %v456_v13 = vrot.slane %v455_v49, 2  ;;  %v462_v23 = vrot.slane %v461_v30, 2  ;;  %v479_v6 = vadd.f32 %v478_v44, %v200_v40 }
  0xf2   :  { %v468_v4 = vrot.slane %v467_v50, 2  ;;  %v474_v5 = vrot.slane %v473_v55, 2  ;;  %v485_v62 = vadd.f32 %v484_v58, %v201_v42  ;;  %v190_v16 = vmul.f32 %v147_v63, %v88_v39 }
  0xf3   :  { %v457_v9 = vadd.f32 %v456_v13, %v455_v49  ;;  %v463_v10 = vadd.f32 %v462_v23, %v461_v30  ;;  %v191_v31 = vmul.f32 %v147_v63, %v89_v12  ;;  %v480_v19 = vrot.slane %v479_v6, 2 }
  0xf4   :  { %v469_v17 = vadd.f32 %v468_v4, %v467_v50  ;;  %v475_v29 = vadd.f32 %v474_v5, %v473_v55  ;;  %v486_v20 = vrot.slane %v485_v62, 2  ;;  %v569_v18 = vsel %vm544_vm4, %v369_v48, %v568_v34 }
  0xf5   :  { %v458_v21 = vrot.slane %v457_v9, 1  ;;  %v192_v22 = vmul.f32 %v147_v63, %v90_v7  ;;  %v193_v24 = vmul.f32 %v147_v63, %v91_v8  ;;  %v464_v25 = vrot.slane %v463_v10, 1  ;;  %v695_v8 = vpop.permute.xlu0 %694 }
  0xf6   :  { %v481_v26 = vadd.f32 %v480_v19, %v479_v6  ;;  %v194_v32 = vmul.f32 %v147_v63, %v92_v14  ;;  %v195_v33 = vmul.f32 %v147_v63, %v93_v15  ;;  %v576_v36 = vsel %vm544_vm4, %v375_v27, %v575_v59 }
  0xf7   :  { %v583_v57 = vsel %vm544_vm4, %v381_v1, %v582_v37  ;;  %v418_v41 = vrot.slane %v190_v16, 4  ;;  %v424_v0 = vrot.slane %v191_v31, 4  ;;  %v459_v35 = vadd.f32 %v458_v21, %v457_v9 }
  0xf8   :  { %v470_v38 = vrot.slane %v469_v17, 1  ;;  %v476_v40 = vrot.slane %v475_v29, 1  ;;  %v487_v42 = vadd.f32 %v486_v20, %v485_v62  ;;  %v430_v34 = vrot.slane %v192_v22, 4 }
  0xf9   :  { %v419_v43 = vadd.f32 %v418_v41, %v190_v16  ;;  %v425_v45 = vadd.f32 %v424_v0, %v191_v31  ;;  %v436_v46 = vrot.slane %v193_v24, 4  ;;  %v465_v52 = vadd.f32 %v464_v25, %v463_v10 }
  0xfa   :  { %v482_v28 = vrot.slane %v481_v26, 1  ;;  %v442_v54 = vrot.slane %v194_v32, 4  ;;  %v448_v48 = vrot.slane %v195_v33, 4  ;;  %v431_v50 = vadd.f32 %v430_v34, %v192_v22 }
  0xfb   :  { %v420_v49 = vrot.slane %v419_v43, 2  ;;  %v426_v30 = vrot.slane %v425_v45, 2  ;;  %v437_v59 = vadd.f32 %v436_v46, %v193_v24  ;;  %v471_v27 = vadd.f32 %v470_v38, %v469_v17 }
  0xfc   :  { %v488_v37 = vrot.slane %v487_v42, 1  ;;  %v443_v55 = vadd.f32 %v442_v54, %v194_v32  ;;  %v449_v44 = vadd.f32 %v448_v48, %v195_v33  ;;  %v432_v39 = vrot.slane %v431_v50, 2 }
  0xfd   :  { %v421_v58 = vadd.f32 %v420_v49, %v419_v43  ;;  %v427_v63 = vadd.f32 %v426_v30, %v425_v45  ;;  %v438_v12 = vrot.slane %v437_v59, 2  ;;  %v477_v1 = vadd.f32 %v476_v40, %v475_v29 }
  0xfe   :  { %v483_v13 = vadd.f32 %v482_v28, %v481_v26  ;;  %v444_v23 = vrot.slane %v443_v55, 2  ;;  %v450_v4 = vrot.slane %v449_v44, 2  ;;  %v433_v62 = vadd.f32 %v432_v39, %v431_v50 }
  0xff   :  { %v422_v5 = vrot.slane %v421_v58, 1  ;;  %v428_v6 = vrot.slane %v427_v63, 1  ;;  %v439_v7 = vadd.f32 %v438_v12, %v437_v59  ;;  %v489_v9 = vadd.f32 %v488_v37, %v487_v42 }
 0x100   :  { %v445_v10 = vadd.f32 %v444_v23, %v443_v55  ;;  %v451_v14 = vadd.f32 %v450_v4, %v449_v44  ;;  %v547_v15 = vsel %vm546_vm5, %v944_v51, %v973_v56  ;;  %v434_v17 = vrot.slane %v433_v62, 1 }
 0x101   :  { %v423_v16 = vadd.f32 %v422_v5, %v421_v58  ;;  %v429_v31 = vadd.f32 %v428_v6, %v427_v63  ;;  %v440_v19 = vrot.slane %v439_v7, 1  ;;  %v556_v21 = vsel %vm546_vm5, %v946_v60, %v976_v47 }
 0x102   :  { %v446_v29 = vrot.slane %v445_v10, 1  ;;  %v452_v20 = vrot.slane %v451_v14, 1  ;;  %737 = vrcp.f32 %v695_v8  ;;  %v435_v22 = vadd.f32 %v434_v17, %v433_v62 }
 0x103   :  { %v441_v24 = vadd.f32 %v440_v19, %v439_v7  ;;  %v563_v25 = vsel %vm546_vm5, %v948_v61, %v979_v53  ;;  %v570_v51 = vsel %vm546_vm5, %v950_v2, %v569_v18  ;;  %v577_v32 = vsel %vm546_vm5, %v952_v3, %v576_v36 }
 0x104   :  { %v447_v56 = vadd.f32 %v446_v29, %v445_v10  ;;  %v453_v26 = vadd.f32 %v452_v20, %v451_v14  ;;  %v584_v33 = vsel %vm546_vm5, %v954_v11, %v583_v57  ;;  %v549_v60 = vsel %vm548_vm6, %v423_v16, %v547_v15 }
 0x105   :  { %v557_v47 = vsel %vm548_vm6, %v429_v31, %v556_v21  ;;  %v564_v41 = vsel %vm548_vm6, %v435_v22, %v563_v25  ;;  %v571_v0 = vsel %vm548_vm6, %v441_v24, %v570_v51  ;;  %v551_v53 = vsel %vm550_vm7, %v459_v35, %v549_v60 }
 0x106   :  { %v578_v61 = vsel %vm548_vm6, %v447_v56, %v577_v32  ;;  %v585_v2 = vsel %vm548_vm6, %v453_v26, %v584_v33  ;;  %v558_v18 = vsel %vm550_vm7, %v465_v52, %v557_v47  ;;  %v565_v3 = vsel %vm550_vm7, %v471_v27, %v564_v41 }
 0x107   :  { %v572_v11 = vsel %vm550_vm7, %v477_v1, %v571_v0  ;;  %v579_v36 = vsel %vm550_vm7, %v483_v13, %v578_v61  ;;  %v586_v57 = vsel %vm550_vm7, %v489_v9, %v585_v2 }
 0x10c   :  { %v738_v38 = vpop.eup %737 }
 0x10d   :  { %v698_v40 = vmul.f32 %v738_v38, %v551_v53  ;;  %v699_v42 = vmul.f32 %v738_v38, %v558_v18  ;;  %v700_v43 = vmul.f32 %v738_v38, %v565_v3  ;;  %v701_v45 = vmul.f32 %v738_v38, %v572_v11 }
 0x10e   :  { %v702_v34 = vmul.f32 %v738_v38, %v579_v36  ;;  %v703_v46 = vmul.f32 %v738_v38, %v586_v57 }
 0x10f   :  { %704 = vst [vmem:[#allocation8] sm:$0xff] %v698_v40  ;;  %705 = vst [vmem:[#allocation8 + $0x8] sm:$0xff] %v699_v42 }
 0x110   :  { %706 = vst [vmem:[#allocation8 + $0x10] sm:$0xff] %v700_v43  ;;  %707 = vst [vmem:[#allocation8 + $0x18] sm:$0xff] %v701_v45 }
 0x111   :  { %708 = vst [vmem:[#allocation8 + $0x20] sm:$0xff] %v702_v34  ;;  %709 = vst [vmem:[#allocation8 + $0x28] sm:$0xff] %v703_v46 }
 0x112   :  { %794 = shalt.err (!%p791_p6)
}
 0x113   :  { %s795_s12 = scalar_lea.hbm %s1025_s2, 768 }
 0x114   :  { %p796_p7 = scmp.ne.s32.totalorder %s1025_s2, %s795_s12  ;;  %p799_p8 = scmp.lt.u32.totalorder %s795_s12, %s1025_s2 }
 0x116   :  { %p801_p9 = pnand %p799_p8, %p796_p7 }
 0x118   :  { %804 = shalt.err (!%p801_p9)
}
 0x119   :  { %719 = dma.vmem_to_hbm [thread:$0]  %s717_s8, 768, %s1025_s2, [#allocation5]  }
 0x11a   :  { %809 = dma.done.wait [#allocation5], 768  }
 0x11b   :  { %810 = vsyncadd [#allocation5], 4294966528 }
 0x11c   :  { %723 = vsyncpa [#allocation4], 1 }
 0x11d   :  { %724 = vsyncpa [#allocation7], 1 }
 0x11e   :  { %725 = vsyncpa [#allocation5], 1 }

</bundles_post_ra>
